<compile_context>
chip_gen: v6e
topology: v6e:2x2x1
jax: 0.10.0
libtpu: 0.0.40
codegen_flags: <defaults>
</compile_context>

<pallas_src>
import math

import jax
import jax.numpy as jnp
from jax.experimental import pallas as pl
from jax.experimental.pallas import tpu as pltpu


def _round_up(n, m):
    return ((n + m - 1) // m) * m


def value_kernel(x_ref, w1_ref, b1_ref, w2_ref, b2_ref, w3_ref, b3_ref, o_ref):
    # x_ref:  (TB, num_inputs) bf16      (streamed per grid step)
    # w1_ref: (num_inputs, 64) bf16      (resident)
    # w2_ref: (64, 64)        bf16       (resident)
    # b1/b2:  (1, 64)         f32        (resident)
    # w3_ref: (1, 64)         f32        (value-head weight row, resident)
    # b3_ref: (1, 1)          f32        (resident)
    x = x_ref[...]
    h1 = jnp.tanh(
        jnp.dot(x, w1_ref[...], preferred_element_type=jnp.float32) + b1_ref[...]
    )
    h2 = jnp.tanh(
        jnp.dot(h1.astype(jnp.bfloat16), w2_ref[...],
                preferred_element_type=jnp.float32) + b2_ref[...]
    )
    # Value head: an N=1 matmul wastes the MXU -> VPU multiply + lane reduction.
    out = jnp.sum(h2 * w3_ref[...], axis=-1, keepdims=True) + b3_ref[...]
    o_ref[...] = out.astype(o_ref.dtype)


def value_forward(x, params, *, block_batch=4096):
    """x: (B, num_inputs) float32 -> (B, 1) float32."""
    w1, b1, w2, b2, w3, b3 = params
    B, num_inputs = x.shape
    hidden = w1.shape[1]

    # Heavy HBM streams in bf16 (halves x traffic, feeds the bf16 MXU natively);
    # everything the VPU/EUP touches stays f32.
    x_bf = x.astype(jnp.bfloat16)
    w1_bf = w1.astype(jnp.bfloat16)
    w2_bf = w2.astype(jnp.bfloat16)
    w3_row = w3.reshape(1, hidden).astype(jnp.float32)   # (1, 64)
    b3_2d = b3.reshape(1, 1).astype(jnp.float32)         # (1, 1)

    # Batch tile: multiple of 16 (bf16 sublane packing); pad B so the grid is exact.
    TB = min(block_batch, _round_up(max(B, 1), 16))
    B_pad = _round_up(B, TB)
    if B_pad != B:
        x_bf = jnp.pad(x_bf, ((0, B_pad - B), (0, 0)))

    grid = (pl.cdiv(B_pad, TB),)

    def resident(shape):
        return pl.BlockSpec(shape, lambda i: (0,) * len(shape))

    out = pl.pallas_call(
        value_kernel,
        out_shape=jax.ShapeDtypeStruct((B_pad, 1), jnp.float32),
        grid=grid,
        in_specs=[
            pl.BlockSpec((TB, num_inputs), lambda i: (i, 0)),  # x tile (streamed)
            resident((num_inputs, hidden)),                    # W1
            resident((1, hidden)),                             # b1
            resident((hidden, hidden)),                        # W2
            resident((1, hidden)),                             # b2
            resident((1, hidden)),                             # value-head weight row
            resident((1, 1)),                                  # value-head bias
        ],
        out_specs=pl.BlockSpec((TB, 1), lambda i: (i, 0)),
        compiler_params=pltpu.CompilerParams(
            dimension_semantics=("parallel",),      # megacore on v7x, no-op on v5e/v6e
            vmem_limit_bytes=32 * 1024 * 1024,      # tiles are tiny; well under v7x 64 MiB
        ),
    )(x_bf, w1_bf, b1, w2_bf, b2, w3_row, b3_2d)
    return out[:B]


def init_params(key, num_inputs, hidden=64):
    """Deterministic init mimicking PyTorch nn.Linear default U(-1/sqrt(fan_in), +),
    with value_head weight * 0.1 and bias * 0.0, as in Value.__init__."""
    k1, k2, k3, k4, k5, k6 = jax.random.split(key, 6)

    def lin_init(kw, kb, fan_in, fan_out):
        bound = 1.0 / math.sqrt(fan_in)
        # weights stored as (in, out) so the kernel computes x @ W
        w = jax.random.uniform(kw, (fan_in, fan_out), jnp.float32, -bound, bound)
        b = jax.random.uniform(kb, (1, fan_out), jnp.float32, -bound, bound)
        return w, b

    w1, b1 = lin_init(k1, k2, num_inputs, hidden)
    w2, b2 = lin_init(k3, k4, hidden, hidden)
    w3, b3 = lin_init(k5, k6, hidden, 1)
    w3 = w3 * 0.1
    b3 = b3 * 0.0
    return (w1, b1, w2, b2, w3, b3)


if __name__ == "__main__":
    key = jax.random.PRNGKey(0)
    num_inputs = 32
    batch = 8

    kx, kp = jax.random.split(key)
    x = jax.random.normal(kx, (batch, num_inputs), dtype=jnp.float32)
    params = init_params(kp, num_inputs)

    out = value_forward(x, params)
    out = jax.block_until_ready(out)

    # Pure-JAX f32 reference; kernel uses bf16 matmul inputs, so loose tolerance.
    w1, b1, w2, b2, w3, b3 = params
    h1 = jnp.tanh(x @ w1 + b1)
    h2 = jnp.tanh(h1 @ w2 + b2)
    ref = h2 @ w3 + b3
    assert out.shape == (batch, 1), out.shape
    assert jnp.allclose(out, ref, atol=1e-2, rtol=1e-2), float(jnp.max(jnp.abs(out - ref)))

    print("KERNEL_OK")
</pallas_src>

<mosaic_0001>
module attributes {stable_mosaic.version = 11 : i64} {
  func.func @value_kernel(%arg0: i32, %arg1: memref<16x32xbf16, #tpu.memory_space<vmem>>, %arg2: memref<32x64xbf16, #tpu.memory_space<vmem>>, %arg3: memref<1x64xf32, #tpu.memory_space<vmem>>, %arg4: memref<64x64xbf16, #tpu.memory_space<vmem>>, %arg5: memref<1x64xf32, #tpu.memory_space<vmem>>, %arg6: memref<1x64xf32, #tpu.memory_space<vmem>>, %arg7: memref<1x1xf32, #tpu.memory_space<vmem>>, %arg8: memref<16x1xf32, #tpu.memory_space<vmem>>) attributes {dimension_semantics = [#tpu.dimension_semantics<parallel>], iteration_bounds = array<i64: 1>, scalar_prefetch = 0 : i64, scratch_operands = 0 : i64, tpu.core_type = #tpu.core_type<tc>, window_params = [{transform_indices = @transform_0, window_bounds = array<i64: 16, 32>}, {pipeline_mode = #tpu.pipeline_mode<synchronous>, transform_indices = @transform_1, window_bounds = array<i64: 32, 64>}, {pipeline_mode = #tpu.pipeline_mode<synchronous>, transform_indices = @transform_2, window_bounds = array<i64: 1, 64>}, {pipeline_mode = #tpu.pipeline_mode<synchronous>, transform_indices = @transform_3, window_bounds = array<i64: 64, 64>}, {pipeline_mode = #tpu.pipeline_mode<synchronous>, transform_indices = @transform_4, window_bounds = array<i64: 1, 64>}, {pipeline_mode = #tpu.pipeline_mode<synchronous>, transform_indices = @transform_5, window_bounds = array<i64: 1, 64>}, {pipeline_mode = #tpu.pipeline_mode<synchronous>, transform_indices = @transform_6, window_bounds = array<i64: 1, 1>}, {transform_indices = @transform_7, window_bounds = array<i64: 16, 1>}]} {
    %c0 = arith.constant 0 : index
    %c0_0 = arith.constant 0 : index
    %0 = vector.load %arg1[%c0, %c0_0] : memref<16x32xbf16, #tpu.memory_space<vmem>>, vector<16x32xbf16>
    %c0_1 = arith.constant 0 : index
    %c0_2 = arith.constant 0 : index
    %1 = vector.load %arg2[%c0_1, %c0_2] : memref<32x64xbf16, #tpu.memory_space<vmem>>, vector<32x64xbf16>
    %cst = arith.constant dense<0.000000e+00> : vector<16x64xf32>
    %2 = tpu.matmul %0, %1, %cst {dimension_numbers = #tpu.dot_dimension_numbers<[1], [0], [0], [1], [0, 0, 1, 1], [], []>} : vector<16x32xbf16>, vector<32x64xbf16>, vector<16x64xf32> -> vector<16x64xf32>
    %c0_3 = arith.constant 0 : index
    %c0_4 = arith.constant 0 : index
    %3 = vector.load %arg3[%c0_3, %c0_4] : memref<1x64xf32, #tpu.memory_space<vmem>>, vector<1x64xf32>
    %4 = vector.broadcast %3 : vector<1x64xf32> to vector<16x64xf32>
    %5 = arith.addf %2, %4 : vector<16x64xf32>
    %6 = math.tanh %5 : vector<16x64xf32>
    %7 = arith.truncf %6 : vector<16x64xf32> to vector<16x64xbf16>
    %c0_5 = arith.constant 0 : index
    %c0_6 = arith.constant 0 : index
    %8 = vector.load %arg4[%c0_5, %c0_6] : memref<64x64xbf16, #tpu.memory_space<vmem>>, vector<64x64xbf16>
    %cst_7 = arith.constant dense<0.000000e+00> : vector<16x64xf32>
    %9 = tpu.matmul %7, %8, %cst_7 {dimension_numbers = #tpu.dot_dimension_numbers<[1], [0], [0], [1], [0, 0, 1, 1], [], []>} : vector<16x64xbf16>, vector<64x64xbf16>, vector<16x64xf32> -> vector<16x64xf32>
    %c0_8 = arith.constant 0 : index
    %c0_9 = arith.constant 0 : index
    %10 = vector.load %arg5[%c0_8, %c0_9] : memref<1x64xf32, #tpu.memory_space<vmem>>, vector<1x64xf32>
    %11 = vector.broadcast %10 : vector<1x64xf32> to vector<16x64xf32>
    %12 = arith.addf %9, %11 : vector<16x64xf32>
    %13 = math.tanh %12 : vector<16x64xf32>
    %c0_10 = arith.constant 0 : index
    %c0_11 = arith.constant 0 : index
    %14 = vector.load %arg6[%c0_10, %c0_11] : memref<1x64xf32, #tpu.memory_space<vmem>>, vector<1x64xf32>
    %15 = vector.broadcast %14 : vector<1x64xf32> to vector<16x64xf32>
    %16 = arith.mulf %13, %15 : vector<16x64xf32>
    %cst_12 = arith.constant dense<0.000000e+00> : vector<16xf32>
    %17 = vector.multi_reduction <add>, %16, %cst_12 [1] : vector<16x64xf32> to vector<16xf32>
    %18 = vector.shape_cast %17 : vector<16xf32> to vector<16x1xf32>
    %c0_13 = arith.constant 0 : index
    %c0_14 = arith.constant 0 : index
    %19 = vector.load %arg7[%c0_13, %c0_14] : memref<1x1xf32, #tpu.memory_space<vmem>>, vector<1x1xf32>
    %20 = vector.broadcast %19 : vector<1x1xf32> to vector<16x1xf32>
    %21 = arith.addf %18, %20 : vector<16x1xf32>
    %c0_15 = arith.constant 0 : index
    %c0_16 = arith.constant 0 : index
    %22 = vector.load %arg8[%c0_15, %c0_16] : memref<16x1xf32, #tpu.memory_space<vmem>>, vector<16x1xf32>
    tpu.vector_store %arg8[%c0_15, %c0_16], %21 {strides = array<i32>} : memref<16x1xf32, #tpu.memory_space<vmem>>, vector<16x1xf32>,
    return
  }
  func.func @transform_0(%arg0: i32) -> (i32, i32) {
    %c0_i32 = arith.constant 0 : i32
    %c0_i32_0 = arith.constant 0 : i32
    return %arg0, %c0_i32 : i32, i32
  }
  func.func @transform_1(%arg0: i32) -> (i32, i32) {
    %c0_i32 = arith.constant 0 : i32
    %c0_i32_0 = arith.constant 0 : i32
    %c0_i32_1 = arith.constant 0 : i32
    return %c0_i32, %c0_i32_0 : i32, i32
  }
  func.func @transform_2(%arg0: i32) -> (i32, i32) {
    %c0_i32 = arith.constant 0 : i32
    %c0_i32_0 = arith.constant 0 : i32
    %c0_i32_1 = arith.constant 0 : i32
    return %c0_i32, %c0_i32_0 : i32, i32
  }
  func.func @transform_3(%arg0: i32) -> (i32, i32) {
    %c0_i32 = arith.constant 0 : i32
    %c0_i32_0 = arith.constant 0 : i32
    %c0_i32_1 = arith.constant 0 : i32
    return %c0_i32, %c0_i32_0 : i32, i32
  }
  func.func @transform_4(%arg0: i32) -> (i32, i32) {
    %c0_i32 = arith.constant 0 : i32
    %c0_i32_0 = arith.constant 0 : i32
    %c0_i32_1 = arith.constant 0 : i32
    return %c0_i32, %c0_i32_0 : i32, i32
  }
  func.func @transform_5(%arg0: i32) -> (i32, i32) {
    %c0_i32 = arith.constant 0 : i32
    %c0_i32_0 = arith.constant 0 : i32
    %c0_i32_1 = arith.constant 0 : i32
    return %c0_i32, %c0_i32_0 : i32, i32
  }
  func.func @transform_6(%arg0: i32) -> (i32, i32) {
    %c0_i32 = arith.constant 0 : i32
    %c0_i32_0 = arith.constant 0 : i32
    %c0_i32_1 = arith.constant 0 : i32
    return %c0_i32, %c0_i32_0 : i32, i32
  }
  func.func @transform_7(%arg0: i32) -> (i32, i32) {
    %c0_i32 = arith.constant 0 : i32
    %c0_i32_0 = arith.constant 0 : i32
    return %arg0, %c0_i32 : i32, i32
  }
}

</mosaic_0001>

<bundles_post_ra>
// kernel: tpu_custom_call.1
= control target key start
LH: loop header
LB: loop body
LE: loop exit
PB: predicated region body
PF: predicated region fallthrough
CT: control target
= control target key end

     0   :  { %s471_s0 = inlined_call_operand.hbm [shape: bf16[16,32], index: 0, kind: input, shape index: {}]   ;;  %s472_s1 = inlined_call_operand.hbm [shape: bf16[32,64], index: 1, kind: input, shape index: {}]   ;;  %s473_s2 = inlined_call_operand.vmem [shape: f32[1,64], index: 2, kind: input, shape index: {}]   ;;  %s474_s3 = inlined_call_operand.hbm [shape: bf16[64,64], index: 3, kind: input, shape index: {}]   ;;  %s475_s4 = inlined_call_operand.vmem [shape: f32[1,64], index: 4, kind: input, shape index: {}]   ;;  %s476_s5 = inlined_call_operand.vmem [shape: f32[1,64], index: 5, kind: input, shape index: {}]   ;;  %s477_s6 = inlined_call_operand.<no memory space> [shape: f32[1,1], index: 6, kind: input, shape index: {}]   ;;  %s478_s7 = inlined_call_operand.vmem [shape: f32[16,1], index: 7, kind: output, shape index: {}]  }
   0x1   :  { %v12_v0 = vstv %s477_s6 }
   0x2   :  { %13 = vst [vmem:[#allocation2] sm:$0x1] %v12_v0 }
   0x3   :  { %14 = vsyncpa [#allocation4], 0 }
   0x4   :  { %15 = vsyncpa [#allocation6], 0  ;;  %s394_s26 = smov [#allocation5]   ;;  %s395_s28 = smov [#allocation3]  }
   0x5   :  { %s33_s27 = sshll.u32 %s394_s26, 4  ;;  %s21_s29 = sshll.u32 %s395_s28, 4  ;;  %s34_s27 = int_to_ptr.vmem [resolvable:$true] %s33_s27  ;;  %s22_s29 = int_to_ptr.vmem [resolvable:$true] %s21_s29 }
   0x6   :  { %s338_s30 = scalar_lea.vmem %s34_s27, 256  ;;  %p343_p1 = scmp.lt.s32.totalorder %s34_s27, %s34_s27 }
   0x7   :  { %p339_p0 = scmp.ne.s32.totalorder %s34_s27, %s338_s30  ;;  %p344_p2 = scmp.lt.s32.totalorder %s338_s30, %s338_s30 }
   0x9   :  { %p345_p3 = por %p344_p2, %p343_p1 }
   0xb   :  { %p346_p4 = pnand %p345_p3, %p339_p0 }
   0xd   :  { %349 = shalt.err (!%p346_p4)
}
   0xe   :  { %s396_s8 = smov 64   ;;  %s397_s9 = smov 4  }
   0xf   :  { %39 = dma.hbm_to_vmem [thread:$0]  %s472_s1, 256, %s34_s27, [#allocation6], %s396_s8, %s396_s8, %s397_s9  }
  0x10   :  { %s358_s11 = scalar_lea.vmem %s22_s29, 128  ;;  %p363_p6 = scmp.lt.s32.totalorder %s22_s29, %s22_s29 }
  0x11   :  { %p359_p5 = scmp.ne.s32.totalorder %s22_s29, %s358_s11  ;;  %p364_p7 = scmp.lt.s32.totalorder %s358_s11, %s358_s11 }
  0x13   :  { %p365_p8 = por %p364_p7, %p363_p6 }
  0x15   :  { %p366_p9 = pnand %p365_p8, %p359_p5 }
  0x17   :  { %369 = shalt.err (!%p366_p9)
}
  0x18   :  { %27 = dma.hbm_to_vmem [thread:$0]  %s471_s0, 128, %s22_s29, [#allocation4], %s396_s8, %s396_s8, %s397_s9  }
  0x19   :  { %s398_s14 = smov [#allocation7]  }
  0x1a   :  { %s47_s15 = sshll.u32 %s398_s14, 4  ;;  %s48_s15 = int_to_ptr.vmem [resolvable:$true] %s47_s15 }
  0x1b   :  { %s378_s16 = scalar_lea.vmem %s48_s15, 512  ;;  %p383_p11 = scmp.lt.s32.totalorder %s48_s15, %s48_s15 }
  0x1c   :  { %p379_p10 = scmp.ne.s32.totalorder %s48_s15, %s378_s16  ;;  %p384_p12 = scmp.lt.s32.totalorder %s378_s16, %s378_s16 }
  0x1e   :  { %p385_p13 = por %p384_p12, %p383_p11 }
  0x20   :  { %p386_p0 = pnand %p385_p13, %p379_p10 }
  0x22   :  { %389 = shalt.err (!%p386_p0)
}
  0x23   :  { %53 = dma.hbm_to_vmem [thread:$0]  %s474_s3, 512, %s48_s15, [#allocation6], %s396_s8, %s396_s8, %s397_s9  }
  0x24   :  { %390 = dma.done.wait [#allocation4], 128  }
  0x25   :  { %391 = vsyncadd [#allocation4], 4294967168 }
  0x26   :  { %392 = dma.done.wait [#allocation6], 768  }
  0x27   :  { %393 = vsyncadd [#allocation6], 4294966528  ;;  %v399_v1 = vmov 0.0   ;;  %vm400_vm0 = vmmov 0   ;;  %v315_v2 = vld [vmem:[#allocation5 + $0x8] sm:$0xff]   ;;  %v316_v3 = vld [vmem:[#allocation5] sm:$0xff]  }
  0x28   :  { %288 = vmatprep.subr.bf16.mxu0 %v399_v1  ;;  %292 = vmatprep.mubr.msk.bf16.mxu0 %vm400_vm0, %v399_v1  ;;  %v317_v4 = vld [vmem:[#allocation3] sm:$0xff]   ;;  %vm100_vm1 = vcmask 261120   ;;  %v318_v5 = vld [vmem:[#allocation7 + $0x18] sm:$0xff]   ;;  %v319_v6 = vld [vmem:[#allocation7 + $0x10] sm:$0xff]   ;;  %vm187_vm2 = vcmask 523264   ;;  %vm258_vm3 = vcmask 7168  }
  0x29   :  { %296 = vmatprep.subr.bf16.mxu1 %v399_v1  ;;  %304 = vmatprep.mubr.msk.bf16.mxu1 %vm400_vm0, %v399_v1  ;;  %v320_v7 = vld [vmem:[#allocation7 + $0x8] sm:$0xff]   ;;  %v321_v8 = vld [vmem:[#allocation7] sm:$0xff]  }
  0x2a   :  { %289 = vmatpush3.bf16.msra.mxu0 %v315_v2  ;;  %297 = vmatpush3.bf16.msra.mxu1 %v318_v5  ;;  %v267_v9 = vld [vmem:[%s473_s2] ss:$0 sm:$0xff] }
  0x2b   :  { %290 = vmatprep.subr.bf16.mxu0 %v399_v1  ;;  %298 = vmatprep.subr.bf16.mxu1 %v399_v1  ;;  %v272_v19 = vld [vmem:[%s475_s4] ss:$0 sm:$0xff] }
  0x2c   :  { %v278_v26 = vld [vmem:[%s476_s5] ss:$0 sm:$0xff] }
  0x2d   :  { %v279_v33 = vld [vmem:[#allocation2] ss:$0 sm:$0xff] }
  0x2e   :  { %291 = vmatpush3.bf16.msra.mxu0 %v316_v3  ;;  %299 = vmatpush3.bf16.msra.mxu1 %v319_v6 }
  0x2f   :  { %300 = vmatprep.subr.bf16.mxu1 %v399_v1 }
  0x31   :  { %293 = vmatmul.mubr.msk.bf16.vlgmr.msra.gmra.mxu0 %vm100_vm1, %v317_v4 }
  0x32   :  { %301 = vmatpush3.bf16.msra.mxu1 %v320_v7 }
  0x33   :  { %302 = vmatprep.subr.bf16.mxu1 %v399_v1 }
  0x36   :  { %303 = vmatpush3.bf16.msra.mxu1 %v321_v8 }
  0xf1   :  { %v138_v10 = vpop.f32.mrf.mxu0 }
  0xf2   :  { %v139_v11 = vadd.f32 %v267_v9, %v138_v10 }
  0xf3   :  { %v294_v12 = vpop.f32.mrf.mxu0 }
  0xf4   :  { %322 = vtanh.f32 %v139_v11 }
  0xf5   :  { %v141_v13 = vpop.f32.mrf.mxu0 }
  0xf6   :  { %v142_v14 = vadd.f32 %v267_v9, %v141_v13 }
  0xf7   :  { %v295_v15 = vpop.f32.mrf.mxu0 }
  0xf8   :  { %324 = vtanh.f32 %v142_v14 }
 0x101   :  { %v323_v16 = vpop.eup %322 }
 0x105   :  { %v325_v17 = vpop.eup %324 }
 0x106   :  { %v147_v18 = vpack.c.bf16 %v325_v17, %v323_v16 }
 0x108   :  { %305 = vmatmul.mubr.msk.bf16.vlgmr.msra.gmra.mxu1 %vm187_vm2, %v147_v18 }
 0x1c8   :  { %v225_v20 = vpop.f32.mrf.mxu1 }
 0x1c9   :  { %v226_v21 = vadd.f32 %v272_v19, %v225_v20 }
 0x1ca   :  { %v306_v22 = vpop.f32.mrf.mxu1 }
 0x1cb   :  { %326 = vtanh.f32 %v226_v21 }
 0x1cc   :  { %v228_v23 = vpop.f32.mrf.mxu1 }
 0x1cd   :  { %v229_v24 = vadd.f32 %v272_v19, %v228_v23 }
 0x1ce   :  { %v307_v25 = vpop.f32.mrf.mxu1 }
 0x1cf   :  { %328 = vtanh.f32 %v229_v24 }
 0x1d8   :  { %v327_v27 = vpop.eup %326 }
 0x1d9   :  { %v241_v28 = vmul.f32 %v327_v27, %v278_v26 }
 0x1db   :  { %v243_v29 = vsel %vm187_vm2, %v241_v28, 0.0 }
 0x1dc   :  { %v329_v30 = vpop.eup %328  ;;  %244 = vadd.xlane.f32.xlu0 %v243_v29 }
 0x1dd   :  { %v242_v31 = vmul.f32 %v329_v30, %v278_v26 }
 0x1df   :  { %v246_v32 = vsel %vm187_vm2, %v242_v31, 0.0 }
 0x1e0   :  { %247 = vadd.xlane.f32.xlu0 %v246_v32 }
 0x265   :  { %v245_v34 = vpop.xlane.xlu0 %244 }
 0x266   :  { %v256_v35 = vadd.f32 %v279_v33, %v245_v34 }
 0x268   :  { %259 = vst.msk [vmem:[%s478_s7] sm:$0xff] %vm258_vm3, %v256_v35 }
 0x269   :  { %v248_v36 = vpop.xlane.xlu0 %247 }
 0x26a   :  { %v257_v37 = vadd.f32 %v279_v33, %v248_v36 }
 0x26c   :  { %260 = vst.msk [vmem:[%s478_s7 + $0x8] sm:$0xff] %vm258_vm3, %v257_v37 }
 0x26d   :  { %265 = vsyncpa [#allocation4], 1 }
 0x26e   :  { %266 = vsyncpa [#allocation6], 1 }

</bundles_post_ra>
